<compile_context>
chip_gen: v5e
topology: v5e:2x2
jax: 0.10.0
libtpu: 0.0.40
codegen_flags: <defaults>
</compile_context>

<pallas_src>
import functools

import jax
import jax.numpy as jnp
from jax.experimental import pallas as pl
from jax.experimental.pallas import tpu as pltpu


def _round_up(x, m):
    return ((x + m - 1) // m) * m


# ----------------------------------------------------------------------------
# Pallas kernel: fused vocab projection + online log-softmax + masked NLL
# (this is LanguageModelCriterion applied to the model's log-probs).
# Grid: (row_tiles [parallel], vocab_tiles [arbitrary]).
# ----------------------------------------------------------------------------
def _nll_kernel(tgt_ref, mask_ref, h_ref, w_ref, out_ref,
                m_sc, l_sc, t_sc, *, vocab_size, tile_vocab):
    # tgt_ref : (TR, 1)  int32     target token ids (labels[:, 1:]), row-padded
    # mask_ref: (TR, 1)  float32   token mask (masks[:, 1:]), row-padded
    # h_ref   : (TR, H)  bfloat16  hidden states (row-padded with zeros)
    # w_ref   : (H, TV)  bfloat16  vocab projection tile (vocab-padded)
    # out_ref : (1,1,128) float32  per-row-tile partials: lane0=nll, lane1=mask
    # m_sc/l_sc/t_sc: (TR,1) f32 scratch — running max / sumexp / target logit
    j = pl.program_id(1)
    nvj = pl.num_programs(1)

    @pl.when(j == 0)
    def _():
        m_sc[...] = jnp.full_like(m_sc, -jnp.inf)
        l_sc[...] = jnp.zeros_like(l_sc)
        t_sc[...] = jnp.zeros_like(t_sc)

    # vocab-tile logits on the MXU (bf16 operands, f32 accumulation)
    logits = jnp.dot(h_ref[...], w_ref[...],
                     preferred_element_type=jnp.float32)          # (TR, TV)

    # tile-local lane index (loop-invariant iota; no full-tile global add)
    lane_local = jax.lax.broadcasted_iota(jnp.int32, logits.shape, 1)

    # target logit: shift the per-row scalar target instead of the iota,
    # gather via a single where (no one-hot convert + full-tile vmul).
    # Vocab-padded lanes can never match since tgt < vocab_size.
    tgt_local = tgt_ref[...] - j * tile_vocab                     # (TR, 1)
    t_sc[...] += jnp.sum(jnp.where(lane_local == tgt_local, logits, 0.0),
                         axis=-1, keepdims=True)

    def online_update(lg):
        m_tile = jnp.max(lg, axis=-1, keepdims=True)              # (TR, 1)
        m_new = jnp.maximum(m_sc[...], m_tile)
        alpha = jnp.exp(m_sc[...] - m_new)
        l_sc[...] = alpha * l_sc[...] + jnp.sum(jnp.exp(lg - m_new),
                                                axis=-1, keepdims=True)
        m_sc[...] = m_new

    if vocab_size % tile_vocab != 0:
        # only the last vocab tile has padded lanes -> pay the select only there
        @pl.when(j < nvj - 1)
        def _():
            online_update(logits)

        @pl.when(j == nvj - 1)
        def _():
            rem = vocab_size - j * tile_vocab                     # scalar
            online_update(jnp.where(lane_local < rem, logits, -1e30))
    else:
        online_update(logits)

    # epilogue: finalize log-softmax, masked NLL, write partials once
    @pl.when(j == nvj - 1)
    def _():
        lse = m_sc[...] + jnp.log(l_sc[...])                      # (TR, 1)
        tgt_lp = t_sc[...] - lse                                  # (TR, 1)
        msk = mask_ref[...]
        nll_sum = jnp.sum(-tgt_lp * msk)                          # scalar
        msk_sum = jnp.sum(msk)                                    # scalar
        lanes = jax.lax.broadcasted_iota(jnp.int32, out_ref.shape, 2)
        out_ref[...] = jnp.where(lanes == 0, nll_sum,
                                 jnp.where(lanes == 1, msk_sum, 0.0))


# ----------------------------------------------------------------------------
# Generation-aware tile / VMEM selection.
# ----------------------------------------------------------------------------
def _chip_defaults():
    kind = ""
    try:
        kind = jax.devices()[0].device_kind.lower()
    except Exception:
        pass
    vmem_phys = None
    try:
        vmem_phys = int(pltpu.get_tpu_info().vmem_capacity_bytes)
    except Exception:
        vmem_phys = None

    if "v7" in kind:
        # 64 MiB physical VMEM, 2 TCs; ridge ~310 flops/byte.
        row_cap, voc_cap = 512, 1024
        phys = vmem_phys or (64 << 20)
        vmem_limit = min(int(0.6 * phys), 40 << 20)
        megacore = True
    elif "v6" in kind:
        # 128 MiB physical VMEM; ridge ~650 flops/byte -> big row tiles.
        row_cap, voc_cap = 1024, 1024
        phys = vmem_phys or (128 << 20)
        vmem_limit = min(int(0.75 * phys), 96 << 20)
        megacore = False
    else:
        # v5e / unknown: small tiles already compute-bound; stay VMEM-safe.
        row_cap, voc_cap = 256, 512
        vmem_limit = 32 << 20
        megacore = False
    return row_cap, voc_cap, vmem_limit, megacore


def _select_row_tile(n_rows, row_cap, megacore):
    if n_rows <= 128:
        return _round_up(max(n_rows, 8), 8)
    tr = min(row_cap, _round_up(n_rows, 128))
    if megacore:
        # guarantee >= 2 row tiles so the "parallel" axis splits across TCs
        half = _round_up((n_rows + 1) // 2, 128)
        tr = min(tr, max(half, 128))
    return tr


def _select_vocab_tile(vocab, voc_cap):
    if vocab <= 128:
        return 128
    return min(voc_cap, _round_up(vocab, 128))


# ----------------------------------------------------------------------------
# LanguageModelCriterion: -sum(logprob[target]*mask)/sum(mask), fused.
# ----------------------------------------------------------------------------
def masked_nll_loss(hidden, w_vocab, targets, masks, *,
                    tile_rows=None, tile_vocab=None):
    R, H = hidden.shape
    H2, V = w_vocab.shape
    assert H == H2

    row_cap, voc_cap, vmem_limit, megacore = _chip_defaults()
    if tile_rows is None:
        tile_rows = _select_row_tile(R, row_cap, megacore)
    if tile_vocab is None:
        tile_vocab = _select_vocab_tile(V, voc_cap)

    n_row_tiles = (R + tile_rows - 1) // tile_rows
    n_voc_tiles = (V + tile_vocab - 1) // tile_vocab
    Rp = n_row_tiles * tile_rows
    Vp = n_voc_tiles * tile_vocab

    # bf16 MXU operands (f32 accumulation inside the kernel)
    h_bf = hidden.astype(jnp.bfloat16)
    w_bf = w_vocab.astype(jnp.bfloat16)
    if Rp != R:
        h_bf = jnp.pad(h_bf, ((0, Rp - R), (0, 0)))
    if Vp != V:
        w_bf = jnp.pad(w_bf, ((0, 0), (0, Vp - V)))

    tgt = targets.reshape(-1, 1).astype(jnp.int32)
    msk = masks.reshape(-1, 1).astype(jnp.float32)
    if Rp != R:
        tgt = jnp.pad(tgt, ((0, Rp - R), (0, 0)))
        msk = jnp.pad(msk, ((0, Rp - R), (0, 0)))   # padded rows masked out

    kernel = functools.partial(_nll_kernel, vocab_size=V, tile_vocab=tile_vocab)

    # scoped-VMEM budget: double-buffered input tiles + logits working set
    vmem_bytes = int(
        2 * (tile_rows * H * 2)            # hidden tiles (bf16, 2 bufs)
        + 2 * (H * tile_vocab * 2)         # weight tiles (bf16, 2 bufs)
        + 2 * 2 * (tile_rows * 4)          # target / mask tiles
        + 2 * (128 * 4)                    # output tile
        + 3 * tile_rows * tile_vocab * 4   # logits + elementwise temporaries
        + 16 * tile_rows * 4               # scratch accumulators + temps
        + (4 << 20)                        # headroom
    )
    vmem_bytes = max(vmem_bytes, 16 << 20)
    vmem_bytes = min(vmem_bytes, vmem_limit)

    cost = pl.CostEstimate(
        flops=2 * Rp * Vp * H,
        transcendentals=Rp * Vp,                                   # exp per logit
        bytes_accessed=(n_row_tiles * H * Vp * 2                   # W re-streamed
                        + Rp * H * 2 + Rp * 8 + n_row_tiles * 512),
    )

    partials = pl.pallas_call(
        kernel,
        out_shape=jax.ShapeDtypeStruct((n_row_tiles, 1, 128), jnp.float32),
        grid_spec=pltpu.PrefetchScalarGridSpec(
            num_scalar_prefetch=0,
            grid=(n_row_tiles, n_voc_tiles),
            in_specs=[
                pl.BlockSpec((tile_rows, 1), lambda i, j: (i, 0)),    # targets
                pl.BlockSpec((tile_rows, 1), lambda i, j: (i, 0)),    # masks
                pl.BlockSpec((tile_rows, H), lambda i, j: (i, 0)),    # hidden
                pl.BlockSpec((H, tile_vocab), lambda i, j: (0, j)),   # W tile
            ],
            out_specs=pl.BlockSpec((1, 1, 128), lambda i, j: (i, 0, 0)),
            scratch_shapes=[
                pltpu.VMEM((tile_rows, 1), jnp.float32),   # running max
                pltpu.VMEM((tile_rows, 1), jnp.float32),   # running sumexp
                pltpu.VMEM((tile_rows, 1), jnp.float32),   # target logit
            ],
        ),
        compiler_params=pltpu.CompilerParams(
            dimension_semantics=("parallel", "arbitrary"),
            vmem_limit_bytes=vmem_bytes,
        ),
        cost_estimate=cost,
    )(tgt, msk, h_bf, w_bf)

    nll_total = jnp.sum(partials[:, 0, 0])
    msk_total = jnp.sum(partials[:, 0, 1])
    return nll_total / jnp.maximum(msk_total, 1.0)


# ----------------------------------------------------------------------------
# Stand-in captioning model (deterministic params, plain-JAX glue): produces
# hidden states for each output position; the Pallas kernel handles the
# vocab projection + log-softmax + criterion.
# ----------------------------------------------------------------------------
def make_params(key, *, vocab, hidden, fc_dim, att_dim):
    k1, k2, k3, k4 = jax.random.split(key, 4)
    scale = 0.05
    return {
        "emb": scale * jax.random.normal(k1, (vocab, hidden), jnp.float32),
        "w_fc": scale * jax.random.normal(k2, (fc_dim, hidden), jnp.float32),
        "w_att": scale * jax.random.normal(k3, (att_dim, hidden), jnp.float32),
        "w_vocab": scale * jax.random.normal(k4, (hidden, vocab), jnp.float32),
    }


def model_hidden(params, fc_feats, att_feats, labels, att_masks):
    # labels: (N, T+1) int32; condition on labels[:, :-1] (teacher forcing)
    inp = labels[:, :-1]                                   # (N, T)
    emb = params["emb"][inp]                               # (N, T, H)
    fc_h = fc_feats @ params["w_fc"]                       # (N, H)
    att_w = att_masks.astype(jnp.float32)                  # (N, A)
    att_pool = (att_feats * att_w[..., None]).sum(1) / jnp.maximum(
        att_w.sum(1, keepdims=True), 1.0)                  # (N, att_dim)
    att_h = att_pool @ params["w_att"]                     # (N, H)
    h = emb + fc_h[:, None, :] + att_h[:, None, :]         # (N, T, H)
    return h


# ----------------------------------------------------------------------------
# LossWrapper.forward equivalent (sc_flag=False, caption_model != 'aat',
# label_smoothing == 0  ->  LanguageModelCriterion).
# ----------------------------------------------------------------------------
def loss_wrapper_forward(params, fc_feats, att_feats, labels, masks,
                         att_masks, gts, gt_indices, sc_flag):
    del gts, gt_indices  # only used on the sc_flag=True (RL) path
    assert not sc_flag, "TODO(synk): RL / self-critical path not kernelized"
    out = {}
    N, Tp1 = labels.shape
    T = Tp1 - 1
    h = model_hidden(params, fc_feats, att_feats, labels, att_masks)  # (N,T,H)
    hidden_flat = h.reshape(N * T, -1)
    loss = masked_nll_loss(
        hidden_flat, params["w_vocab"],
        labels[:, 1:],          # target = labels[:, 1:]
        masks[:, 1:],           # mask   = masks[:, 1:]
    )
    out["loss"] = loss
    return out


if __name__ == "__main__":
    # small, deterministic example shapes (V=1000 exercises vocab padding)
    N, T, A = 2, 8, 4            # batch, caption length, #att regions
    FC_DIM, ATT_DIM, H, V = 16, 16, 64, 1000

    key = jax.random.PRNGKey(0)
    kp, k1, k2, k3 = jax.random.split(key, 4)

    params = make_params(kp, vocab=V, hidden=H, fc_dim=FC_DIM, att_dim=ATT_DIM)

    fc_feats = jax.random.normal(k1, (N, FC_DIM), jnp.float32)
    att_feats = jax.random.normal(k2, (N, A, ATT_DIM), jnp.float32)
    labels = jax.random.randint(k3, (N, T + 1), 0, V, dtype=jnp.int32)
    # mask: first 6 positions valid, rest padded
    masks = (jnp.arange(T + 1)[None, :] < 6).astype(jnp.float32)
    masks = jnp.broadcast_to(masks, (N, T + 1))
    att_masks = jnp.ones((N, A), jnp.float32)

    out = loss_wrapper_forward(params, fc_feats, att_feats, labels, masks,
                               att_masks, gts=None, gt_indices=None,
                               sc_flag=False)
    loss = jax.block_until_ready(out["loss"])

    # sanity check vs. plain-JAX reference of the same criterion (same bf16
    # MXU operands, f32 accumulation, full log_softmax)
    h_ref = model_hidden(params, fc_feats, att_feats, labels, att_masks)
    h_bf = h_ref.reshape(N * T, H).astype(jnp.bfloat16)
    w_bf = params["w_vocab"].astype(jnp.bfloat16)
    logits_ref = jnp.dot(h_bf, w_bf, preferred_element_type=jnp.float32)
    lp_ref = jax.nn.log_softmax(logits_ref, axis=-1)
    tgt = labels[:, 1:].reshape(-1)
    mskv = masks[:, 1:].reshape(-1)
    ref = -(lp_ref[jnp.arange(N * T), tgt] * mskv).sum() / jnp.maximum(
        mskv.sum(), 1.0)
    assert jnp.allclose(loss, ref, rtol=1e-4, atol=1e-4), (loss, ref)

    # also exercise the multi-tile (row-tiled + vocab-tiled, padded last tile)
    # online-softmax path explicitly, independent of chip-default tile sizes
    loss2 = masked_nll_loss(h_ref.reshape(N * T, H), params["w_vocab"],
                            labels[:, 1:], masks[:, 1:],
                            tile_rows=8, tile_vocab=256)
    loss2 = jax.block_until_ready(loss2)
    assert jnp.allclose(loss2, ref, rtol=1e-4, atol=1e-4), (loss2, ref)

    print("KERNEL_OK")
</pallas_src>

<mosaic_0001>
module attributes {stable_mosaic.version = 11 : i64} {
  func.func @_nll_kernel(%arg0: i32, %arg1: i32, %arg2: memref<16x1xi32, #tpu.memory_space<vmem>>, %arg3: memref<16x1xf32, #tpu.memory_space<vmem>>, %arg4: memref<16x64xbf16, #tpu.memory_space<vmem>>, %arg5: memref<64x512xbf16, #tpu.memory_space<vmem>>, %arg6: memref<1x1x128xf32, #tpu.memory_space<vmem>>, %arg7: memref<16x1xf32, #tpu.memory_space<vmem>>, %arg8: memref<16x1xf32, #tpu.memory_space<vmem>>, %arg9: memref<16x1xf32, #tpu.memory_space<vmem>>) attributes {dimension_semantics = [#tpu.dimension_semantics<parallel>, #tpu.dimension_semantics<arbitrary>], iteration_bounds = array<i64: 1, 2>, scalar_prefetch = 0 : i64, scratch_operands = 3 : i64, tpu.core_type = #tpu.core_type<tc>, window_params = [{transform_indices = @transform_0, window_bounds = array<i64: 16, 1>}, {transform_indices = @transform_1, window_bounds = array<i64: 16, 1>}, {transform_indices = @transform_2, window_bounds = array<i64: 16, 64>}, {transform_indices = @transform_3, window_bounds = array<i64: 64, 512>}, {transform_indices = @transform_4, window_bounds = array<i64: 1, 1, 128>}]} {
    %c0_i32 = arith.constant 0 : i32
    %0 = arith.cmpi eq, %arg1, %c0_i32 : i32
    %1 = arith.extui %0 : i1 to i32
    %c0_i32_0 = arith.constant 0 : i32
    %2 = arith.cmpi ne, %1, %c0_i32_0 : i32
    scf.if %2 {
      %cst_17 = arith.constant 0xFF800000 : f32
      %29 = vector.broadcast %cst_17 : f32 to vector<16x1xf32>
      %c0_18 = arith.constant 0 : index
      %c0_19 = arith.constant 0 : index
      %30 = vector.load %arg7[%c0_18, %c0_19] : memref<16x1xf32, #tpu.memory_space<vmem>>, vector<16x1xf32>
      tpu.vector_store %arg7[%c0_18, %c0_19], %29 {strides = array<i32>} : memref<16x1xf32, #tpu.memory_space<vmem>>, vector<16x1xf32>,
      %cst_20 = arith.constant 0.000000e+00 : f32
      %31 = vector.broadcast %cst_20 : f32 to vector<16x1xf32>
      %c0_21 = arith.constant 0 : index
      %c0_22 = arith.constant 0 : index
      %32 = vector.load %arg8[%c0_21, %c0_22] : memref<16x1xf32, #tpu.memory_space<vmem>>, vector<16x1xf32>
      tpu.vector_store %arg8[%c0_21, %c0_22], %31 {strides = array<i32>} : memref<16x1xf32, #tpu.memory_space<vmem>>, vector<16x1xf32>,
      %cst_23 = arith.constant 0.000000e+00 : f32
      %33 = vector.broadcast %cst_23 : f32 to vector<16x1xf32>
      %c0_24 = arith.constant 0 : index
      %c0_25 = arith.constant 0 : index
      %34 = vector.load %arg9[%c0_24, %c0_25] : memref<16x1xf32, #tpu.memory_space<vmem>>, vector<16x1xf32>
      tpu.vector_store %arg9[%c0_24, %c0_25], %33 {strides = array<i32>} : memref<16x1xf32, #tpu.memory_space<vmem>>, vector<16x1xf32>,
    } else {
    }
    %c0 = arith.constant 0 : index
    %c0_1 = arith.constant 0 : index
    %3 = vector.load %arg4[%c0, %c0_1] : memref<16x64xbf16, #tpu.memory_space<vmem>>, vector<16x64xbf16>
    %c0_2 = arith.constant 0 : index
    %c0_3 = arith.constant 0 : index
    %4 = vector.load %arg5[%c0_2, %c0_3] : memref<64x512xbf16, #tpu.memory_space<vmem>>, vector<64x512xbf16>
    %cst = arith.constant dense<0.000000e+00> : vector<16x512xf32>
    %5 = tpu.matmul %3, %4, %cst {dimension_numbers = #tpu.dot_dimension_numbers<[1], [0], [0], [1], [0, 0, 1, 1], [], []>} : vector<16x64xbf16>, vector<64x512xbf16>, vector<16x512xf32> -> vector<16x512xf32>
    %6 = tpu.iota {dimensions = array<i32: 1>} : vector<16x512xi32>
    %c0_4 = arith.constant 0 : index
    %c0_5 = arith.constant 0 : index
    %7 = vector.load %arg2[%c0_4, %c0_5] : memref<16x1xi32, #tpu.memory_space<vmem>>, vector<16x1xi32>
    %c512_i32 = arith.constant 512 : i32
    %8 = arith.muli %arg1, %c512_i32 : i32
    %9 = vector.broadcast %8 : i32 to vector<16x1xi32>
    %10 = arith.subi %7, %9 : vector<16x1xi32>
    %c0_6 = arith.constant 0 : index
    %c0_7 = arith.constant 0 : index
    %11 = vector.load %arg9[%c0_6, %c0_7] : memref<16x1xf32, #tpu.memory_space<vmem>>, vector<16x1xf32>
    %12 = vector.broadcast %10 : vector<16x1xi32> to vector<16x512xi32>
    %13 = arith.cmpi eq, %6, %12 : vector<16x512xi32>
    %cst_8 = arith.constant 0.000000e+00 : f32
    %14 = vector.broadcast %cst_8 : f32 to vector<16x512xf32>
    %15 = arith.select %13, %5, %14 : vector<16x512xi1>, vector<16x512xf32>
    %cst_9 = arith.constant dense<0.000000e+00> : vector<16xf32>
    %16 = vector.multi_reduction <add>, %15, %cst_9 [1] : vector<16x512xf32> to vector<16xf32>
    %17 = vector.shape_cast %16 : vector<16xf32> to vector<16x1xf32>
    %18 = arith.addf %11, %17 : vector<16x1xf32>
    %c0_10 = arith.constant 0 : index
    %c0_11 = arith.constant 0 : index
    %19 = vector.load %arg9[%c0_10, %c0_11] : memref<16x1xf32, #tpu.memory_space<vmem>>, vector<16x1xf32>
    tpu.vector_store %arg9[%c0_10, %c0_11], %18 {strides = array<i32>} : memref<16x1xf32, #tpu.memory_space<vmem>>, vector<16x1xf32>,
    %c1_i32 = arith.constant 1 : i32
    %20 = arith.cmpi slt, %arg1, %c1_i32 : i32
    %21 = arith.extui %20 : i1 to i32
    %c0_i32_12 = arith.constant 0 : i32
    %22 = arith.cmpi ne, %21, %c0_i32_12 : i32
    scf.if %22 {
      %cst_17 = arith.constant dense<0xFF800000> : vector<16xf32>
      %29 = vector.multi_reduction <maximumf>, %5, %cst_17 [1] : vector<16x512xf32> to vector<16xf32>
      %30 = vector.shape_cast %29 : vector<16xf32> to vector<16x1xf32>
      %c0_18 = arith.constant 0 : index
      %c0_19 = arith.constant 0 : index
      %31 = vector.load %arg7[%c0_18, %c0_19] : memref<16x1xf32, #tpu.memory_space<vmem>>, vector<16x1xf32>
      %32 = arith.maximumf %31, %30 : vector<16x1xf32>
      %c0_20 = arith.constant 0 : index
      %c0_21 = arith.constant 0 : index
      %33 = vector.load %arg7[%c0_20, %c0_21] : memref<16x1xf32, #tpu.memory_space<vmem>>, vector<16x1xf32>
      %34 = arith.subf %33, %32 : vector<16x1xf32>
      %35 = math.exp %34 : vector<16x1xf32>
      %c0_22 = arith.constant 0 : index
      %c0_23 = arith.constant 0 : index
      %36 = vector.load %arg8[%c0_22, %c0_23] : memref<16x1xf32, #tpu.memory_space<vmem>>, vector<16x1xf32>
      %37 = arith.mulf %35, %36 : vector<16x1xf32>
      %38 = vector.broadcast %32 : vector<16x1xf32> to vector<16x512xf32>
      %39 = arith.subf %5, %38 : vector<16x512xf32>
      %40 = math.exp %39 : vector<16x512xf32>
      %cst_24 = arith.constant dense<0.000000e+00> : vector<16xf32>
      %41 = vector.multi_reduction <add>, %40, %cst_24 [1] : vector<16x512xf32> to vector<16xf32>
      %42 = vector.shape_cast %41 : vector<16xf32> to vector<16x1xf32>
      %43 = arith.addf %37, %42 : vector<16x1xf32>
      %c0_25 = arith.constant 0 : index
      %c0_26 = arith.constant 0 : index
      %44 = vector.load %arg8[%c0_25, %c0_26] : memref<16x1xf32, #tpu.memory_space<vmem>>, vector<16x1xf32>
      tpu.vector_store %arg8[%c0_25, %c0_26], %43 {strides = array<i32>} : memref<16x1xf32, #tpu.memory_space<vmem>>, vector<16x1xf32>,
      %c0_27 = arith.constant 0 : index
      %c0_28 = arith.constant 0 : index
      %45 = vector.load %arg7[%c0_27, %c0_28] : memref<16x1xf32, #tpu.memory_space<vmem>>, vector<16x1xf32>
      tpu.vector_store %arg7[%c0_27, %c0_28], %32 {strides = array<i32>} : memref<16x1xf32, #tpu.memory_space<vmem>>, vector<16x1xf32>,
    } else {
    }
    %c1_i32_13 = arith.constant 1 : i32
    %23 = arith.cmpi eq, %arg1, %c1_i32_13 : i32
    %24 = arith.extui %23 : i1 to i32
    %c0_i32_14 = arith.constant 0 : i32
    %25 = arith.cmpi ne, %24, %c0_i32_14 : i32
    scf.if %25 {
      %c512_i32_17 = arith.constant 512 : i32
      %29 = arith.muli %arg1, %c512_i32_17 : i32
      %c1000_i32 = arith.constant 1000 : i32
      %30 = arith.subi %c1000_i32, %29 : i32
      %31 = vector.broadcast %30 : i32 to vector<16x512xi32>
      %32 = arith.cmpi slt, %6, %31 : vector<16x512xi32>
      %cst_18 = arith.constant -1.000000e+30 : f32
      %33 = vector.broadcast %cst_18 : f32 to vector<16x512xf32>
      %34 = arith.select %32, %5, %33 : vector<16x512xi1>, vector<16x512xf32>
      %cst_19 = arith.constant dense<0xFF800000> : vector<16xf32>
      %35 = vector.multi_reduction <maximumf>, %34, %cst_19 [1] : vector<16x512xf32> to vector<16xf32>
      %36 = vector.shape_cast %35 : vector<16xf32> to vector<16x1xf32>
      %c0_20 = arith.constant 0 : index
      %c0_21 = arith.constant 0 : index
      %37 = vector.load %arg7[%c0_20, %c0_21] : memref<16x1xf32, #tpu.memory_space<vmem>>, vector<16x1xf32>
      %38 = arith.maximumf %37, %36 : vector<16x1xf32>
      %c0_22 = arith.constant 0 : index
      %c0_23 = arith.constant 0 : index
      %39 = vector.load %arg7[%c0_22, %c0_23] : memref<16x1xf32, #tpu.memory_space<vmem>>, vector<16x1xf32>
      %40 = arith.subf %39, %38 : vector<16x1xf32>
      %41 = math.exp %40 : vector<16x1xf32>
      %c0_24 = arith.constant 0 : index
      %c0_25 = arith.constant 0 : index
      %42 = vector.load %arg8[%c0_24, %c0_25] : memref<16x1xf32, #tpu.memory_space<vmem>>, vector<16x1xf32>
      %43 = arith.mulf %41, %42 : vector<16x1xf32>
      %44 = vector.broadcast %38 : vector<16x1xf32> to vector<16x512xf32>
      %45 = arith.subf %34, %44 : vector<16x512xf32>
      %46 = math.exp %45 : vector<16x512xf32>
      %cst_26 = arith.constant dense<0.000000e+00> : vector<16xf32>
      %47 = vector.multi_reduction <add>, %46, %cst_26 [1] : vector<16x512xf32> to vector<16xf32>
      %48 = vector.shape_cast %47 : vector<16xf32> to vector<16x1xf32>
      %49 = arith.addf %43, %48 : vector<16x1xf32>
      %c0_27 = arith.constant 0 : index
      %c0_28 = arith.constant 0 : index
      %50 = vector.load %arg8[%c0_27, %c0_28] : memref<16x1xf32, #tpu.memory_space<vmem>>, vector<16x1xf32>
      tpu.vector_store %arg8[%c0_27, %c0_28], %49 {strides = array<i32>} : memref<16x1xf32, #tpu.memory_space<vmem>>, vector<16x1xf32>,
      %c0_29 = arith.constant 0 : index
      %c0_30 = arith.constant 0 : index
      %51 = vector.load %arg7[%c0_29, %c0_30] : memref<16x1xf32, #tpu.memory_space<vmem>>, vector<16x1xf32>
      tpu.vector_store %arg7[%c0_29, %c0_30], %38 {strides = array<i32>} : memref<16x1xf32, #tpu.memory_space<vmem>>, vector<16x1xf32>,
    } else {
    }
    %c1_i32_15 = arith.constant 1 : i32
    %26 = arith.cmpi eq, %arg1, %c1_i32_15 : i32
    %27 = arith.extui %26 : i1 to i32
    %c0_i32_16 = arith.constant 0 : i32
    %28 = arith.cmpi ne, %27, %c0_i32_16 : i32
    scf.if %28 {
      %c0_17 = arith.constant 0 : index
      %c0_18 = arith.constant 0 : index
      %29 = vector.load %arg7[%c0_17, %c0_18] : memref<16x1xf32, #tpu.memory_space<vmem>>, vector<16x1xf32>
      %c0_19 = arith.constant 0 : index
      %c0_20 = arith.constant 0 : index
      %30 = vector.load %arg8[%c0_19, %c0_20] : memref<16x1xf32, #tpu.memory_space<vmem>>, vector<16x1xf32>
      %31 = math.log %30 : vector<16x1xf32>
      %32 = arith.addf %29, %31 : vector<16x1xf32>
      %c0_21 = arith.constant 0 : index
      %c0_22 = arith.constant 0 : index
      %33 = vector.load %arg9[%c0_21, %c0_22] : memref<16x1xf32, #tpu.memory_space<vmem>>, vector<16x1xf32>
      %34 = arith.subf %33, %32 : vector<16x1xf32>
      %c0_23 = arith.constant 0 : index
      %c0_24 = arith.constant 0 : index
      %35 = vector.load %arg3[%c0_23, %c0_24] : memref<16x1xf32, #tpu.memory_space<vmem>>, vector<16x1xf32>
      %cst_25 = arith.constant 0.000000e+00 : f32
      %36 = vector.broadcast %cst_25 : f32 to vector<16x1xf32>
      %37 = arith.subf %36, %34 : vector<16x1xf32>
      %38 = arith.mulf %37, %35 : vector<16x1xf32>
      %39 = vector.shape_cast %38 : vector<16x1xf32> to vector<1x16x1xf32>
      %cst_26 = arith.constant dense<0.000000e+00> : vector<1xf32>
      %40 = vector.multi_reduction <add>, %39, %cst_26 [1, 2] : vector<1x16x1xf32> to vector<1xf32>
      %41 = vector.shape_cast %40 : vector<1xf32> to vector<1x1x1xf32>
      %42 = vector.extract %41[0, 0, 0] : f32 from vector<1x1x1xf32>
      %43 = vector.shape_cast %35 : vector<16x1xf32> to vector<1x16x1xf32>
      %cst_27 = arith.constant dense<0.000000e+00> : vector<1xf32>
      %44 = vector.multi_reduction <add>, %43, %cst_27 [1, 2] : vector<1x16x1xf32> to vector<1xf32>
      %45 = vector.shape_cast %44 : vector<1xf32> to vector<1x1x1xf32>
      %46 = vector.extract %45[0, 0, 0] : f32 from vector<1x1x1xf32>
      %47 = tpu.iota {dimensions = array<i32: 2>} : vector<1x1x128xi32>
      %c0_i32_28 = arith.constant 0 : i32
      %48 = vector.broadcast %c0_i32_28 : i32 to vector<1x1x128xi32>
      %49 = arith.cmpi eq, %47, %48 : vector<1x1x128xi32>
      %c1_i32_29 = arith.constant 1 : i32
      %50 = vector.broadcast %c1_i32_29 : i32 to vector<1x1x128xi32>
      %51 = arith.cmpi eq, %47, %50 : vector<1x1x128xi32>
      %cst_30 = arith.constant 0.000000e+00 : f32
      %52 = vector.broadcast %46 : f32 to vector<1x1x128xf32>
      %53 = vector.broadcast %cst_30 : f32 to vector<1x1x128xf32>
      %54 = arith.select %51, %52, %53 : vector<1x1x128xi1>, vector<1x1x128xf32>
      %55 = vector.broadcast %42 : f32 to vector<1x1x128xf32>
      %56 = arith.select %49, %55, %54 : vector<1x1x128xi1>, vector<1x1x128xf32>
      %c0_31 = arith.constant 0 : index
      %c0_32 = arith.constant 0 : index
      %c0_33 = arith.constant 0 : index
      %57 = vector.load %arg6[%c0_31, %c0_32, %c0_33] : memref<1x1x128xf32, #tpu.memory_space<vmem>>, vector<1x1x128xf32>
      tpu.vector_store %arg6[%c0_31, %c0_32, %c0_33], %56 {strides = array<i32>} : memref<1x1x128xf32, #tpu.memory_space<vmem>>, vector<1x1x128xf32>,
    } else {
    }
    return
  }
  func.func @transform_0(%arg0: i32, %arg1: i32) -> (i32, i32) {
    %c0_i32 = arith.constant 0 : i32
    %c0_i32_0 = arith.constant 0 : i32
    return %arg0, %c0_i32 : i32, i32
  }
  func.func @transform_1(%arg0: i32, %arg1: i32) -> (i32, i32) {
    %c0_i32 = arith.constant 0 : i32
    %c0_i32_0 = arith.constant 0 : i32
    return %arg0, %c0_i32 : i32, i32
  }
  func.func @transform_2(%arg0: i32, %arg1: i32) -> (i32, i32) {
    %c0_i32 = arith.constant 0 : i32
    %c0_i32_0 = arith.constant 0 : i32
    return %arg0, %c0_i32 : i32, i32
  }
  func.func @transform_3(%arg0: i32, %arg1: i32) -> (i32, i32) {
    %c0_i32 = arith.constant 0 : i32
    %c0_i32_0 = arith.constant 0 : i32
    return %c0_i32, %arg1 : i32, i32
  }
  func.func @transform_4(%arg0: i32, %arg1: i32) -> (i32, i32, i32) {
    %c0_i32 = arith.constant 0 : i32
    %c0_i32_0 = arith.constant 0 : i32
    %c0_i32_1 = arith.constant 0 : i32
    return %arg0, %c0_i32, %c0_i32_0 : i32, i32, i32
  }
}

</mosaic_0001>

<bundles_post_ra>
// kernel: tpu_custom_call.1
= control target key start
LH: loop header
LB: loop body
LE: loop exit
PB: predicated region body
PF: predicated region fallthrough
CT: control target
= control target key end

     0   :  { %9 = vsyncpa [#allocation6], 0  ;;  %s1465_s0 = inlined_call_operand.vmem [shape: s32[16,1], index: 0, kind: input, shape index: {}]   ;;  %s1466_s1 = inlined_call_operand.vmem [shape: f32[16,1], index: 1, kind: input, shape index: {}]   ;;  %s1467_s2 = inlined_call_operand.vmem [shape: bf16[16,64], index: 2, kind: input, shape index: {}]   ;;  %s1468_s3 = inlined_call_operand.hbm [shape: bf16[64,1024], index: 3, kind: input, shape index: {}]   ;;  %s1469_s4 = inlined_call_operand.hbm [shape: f32[1,1,128], index: 4, kind: output, shape index: {}]  }
   0x1   :  { %11 = vsyncpa [#allocation6 + $0x1], 0 }
   0x2   :  { %12 = vsyncpa [#allocation7], 0  ;;  %s1231_s15 = smov 0   ;;  %s1233_s16 = smov 0  }
   0x3   :  { %s1235_s17 = smov 0   ;;  %s1237_s18 = smov 0  }
   0x4   :  { %s1239_s19 = smov 0   ;;  %s1241_s20 = smov 0  }
   0x5 LB: > { %s851_s21 = sadd.s32 4294967295, %s1195_s20   ;;  %s27_s22 = sadd.s32 1, %s1191_s19  ;;  %s1195_s20 = sphi %s1241_s20, %s18_s20   ;;  %s1191_s19 = sphi %s1239_s19, %s1476_s19   ;;  %s1187_s18 = sphi %s1237_s18, %s1475_s18   ;;  %s1183_s17 = sphi %s1235_s17, %s1474_s17   ;;  %s1179_s16 = sphi %s1233_s16, %s1473_s16   ;;  %s1175_s15 = sphi %s1231_s15, %s1472_s15  }
   0x6   : > { %p28_p0 = scmp.ge.s32.totalorder %s27_s22, 2  ;;  %s115_s23 = sadd.s32 1, %s1183_s17 }
   0x7   : > { %p122_p1 = scmp.ne.s32.totalorder %s1183_s17, %s1179_s16  ;;  %p123_p2 = scmp.eq.s32.totalorder %s1195_s20, 0 }
   0x8   : > { %s1478_s22 = smov (%p28_p0, %s27_s22), 0  ;;  %p128_p4 = scmp.ne.s32.totalorder %s1179_s16, %s1175_s15 }
   0x9   : > { %p1267_p3 = por %p123_p2, %p122_p1  ;;  %s112_s25 = ssub.s32 %s1191_s19, %s1478_s22 }
   0xa   : > { %p129_p5 = scmp.eq.s32.totalorder %s851_s21, 0  ;;  %p113_p6 = scmp.eq.s32.totalorder %s112_s25, 0 }
   0xb   : > { %p974_p8 = scmp.lt.s32.totalorder %s1195_s20, 2  ;;  %s205_s28 = sand.u32 1, %s1183_s17  }
   0xc   : > { %p1276_p7 = por %p129_p5, %p128_p4  ;;  %s942_s29 = sshll.u32 %s1191_s19, 4 }
   0xd   : > { %s1282_s27 = scalar_select %p113_p6, %s1183_s17, %s115_s23  }
   0xe   : > { %s857_s30 = sshll.u32 %s205_s28, 7  ;;  %s214_s7 = scalar_lea.hbm %s1468_s3, %s942_s29 }
   0xf   : > { %s215_s8 = sshll.u32 %s214_s7, 4  ;;  %s209_s9 = scalar_lea.vmem [#allocation5], %s857_s30  ;;  %s216_s8 = int_to_ptr.hbm [resolvable:$true] %s215_s8 }
  0x10   : > { %s217_s10 = sshll.u32 %s209_s9, 4  ;;  %p971_p9 = pnand %p974_p8, %p1267_p3  ;;  %s218_s10 = int_to_ptr.vmem [resolvable:$true] %s217_s10 }
  0x11   : > { %p860_p10 = scmp.ge.s32.totalorder %s1195_s20, 1  ;;  %s206_s11 = scalar_lea.sflag [#allocation6], %s205_s28 }
  0x12   : > { %s1197_s12 = smov 512   ;;  %s1198_s13 = smov 256  }
  0x13   : > { %s1199_s14 = smov 16   ;;  %p225_p11 = scmp.lt.s32.totalorder %s1195_s20, 3 }
  0x14   : > { %973 = dma.hbm_to_vmem [thread:$0]  (!%p971_p9), %s216_s8, 2048, %s218_s10, %s206_s11, %s1197_s12, %s1198_s13, %s1199_s14  }
  0x15   : > { %p226_p12 = pnand %p860_p10, %p225_p11 }
  0x16   : > { %s231_s15 = sand.u32 (!%p226_p12), 1, %s1179_s16  }
  0x17   : > { %229 = sbr.rel (%p226_p12) target bundleno = 1317 (0x525), region = 36  ;;  %s861_s23 = sshll.u32 (!%p226_p12), %s231_s15, 7 }
  0x18   : > { %s232_s25 = scalar_lea.sflag (!%p226_p12), [#allocation6], %s231_s15  ;;  %s1294_s29 = scalar_lea.vmem (!%p226_p12), [#allocation5], %s861_s23 }
  0x1c   : > { %1166 = dma.done.wait (%p1276_p7), %s232_s25, 2048  }
  0x1d   : > { %1168 = vsyncadd (%p1276_p7), %s232_s25, 4294965248  ;;  %p862_p13 = scmp.ne.s32.totalorder %s1187_s18, 0 }
  0x1f   : > { %294 = sbr.rel (%p862_p13) target bundleno = 43 (0x2b), region = 44 }
  0x24   : > { %vm295_vm0 = vcmask 7168   ;;  %v1200_v0 = vmov -inf   ;;  %v1201_v1 = vmov 0.0  }
  0x25   : > { %296 = vst.msk [vmem:[#allocation2] sm:$0xff] %vm295_vm0, %v1200_v0 }
  0x26   : > { %297 = vst.msk [vmem:[#allocation2 + $0x8] sm:$0xff] %vm295_vm0, %v1200_v0 }
  0x27   : > { %298 = vst.msk [vmem:[#allocation3] sm:$0xff] %vm295_vm0, %v1201_v1 }
  0x28   : > { %299 = vst.msk [vmem:[#allocation3 + $0x8] sm:$0xff] %vm295_vm0, %v1201_v1 }
  0x29   : > { %300 = vst.msk [vmem:[#allocation4] sm:$0xff] %vm295_vm0, %v1201_v1 }
  0x2a   : > { %301 = vst.msk [vmem:[#allocation4 + $0x8] sm:$0xff] %vm295_vm0, %v1201_v1 }
  0x2b PF: > { %v917_v2 = vld [vmem:[%s1294_s29 + $0x60] sm:$0xf]  ;;  %v958_v3 = vld [vmem:[%s1294_s29 + $0x6c] sm:$0xf0]  ;;  %v956_v4 = vld [vmem:[%s1294_s29 + $0x64] sm:$0xf]  ;;  %v465_v57 = vlaneseq }
  0x2c   : > { %v918_v5 = vor.u32 %v958_v3, %v917_v2  ;;  %v919_v6 = vld [vmem:[%s1294_s29 + $0x70] sm:$0xf0]  ;;  %v925_v7 = vld [vmem:[%s1294_s29 + $0x68] sm:$0xf]  ;;  %v959_v8 = vld [vmem:[%s1294_s29 + $0x74] sm:$0xf0] }
  0x2d   : > { %v922_v9 = vor.u32 %v956_v4, %v919_v6  ;;  %v926_v10 = vor.u32 %v959_v8, %v925_v7  ;;  %v957_v11 = vld [vmem:[%s1294_s29 + $0x6c] sm:$0xf]  ;;  %v927_v12 = vld [vmem:[%s1294_s29 + $0x78] sm:$0xf0]  ;;  %v901_v13 = vld [vmem:[%s1294_s29 + $0x40] sm:$0xf] }
  0x2e   : > { %413 = vmatpush.bf16.msra.mxu0 %v918_v5  ;;  %v930_v14 = vor.u32 %v957_v11, %v927_v12  ;;  %v954_v15 = vld [vmem:[%s1294_s29 + $0x4c] sm:$0xf0]  ;;  %v952_v16 = vld [vmem:[%s1294_s29 + $0x44] sm:$0xf]  ;;  %v903_v17 = vld [vmem:[%s1294_s29 + $0x50] sm:$0xf0] }
  0x2f   : > { %427 = vmatpush.bf16.msra.mxu1 %v922_v9  ;;  %441 = vmatpush.bf16.msra.mxu2 %v926_v10  ;;  %v902_v18 = vor.u32 %v954_v15, %v901_v13  ;;  %v906_v19 = vor.u32 %v952_v16, %v903_v17  ;;  %v909_v20 = vld [vmem:[%s1294_s29 + $0x48] sm:$0xf]  ;;  %v955_v21 = vld [vmem:[%s1294_s29 + $0x54] sm:$0xf0]  ;;  %v953_v22 = vld [vmem:[%s1294_s29 + $0x4c] sm:$0xf] }
  0x30   : > { %455 = vmatpush.bf16.msra.mxu3 %v930_v14  ;;  %v910_v23 = vor.u32 %v955_v21, %v909_v20  ;;  %v911_v24 = vld [vmem:[%s1294_s29 + $0x58] sm:$0xf0]  ;;  %v885_v25 = vld [vmem:[%s1294_s29 + $0x20] sm:$0xf]  ;;  %v950_v26 = vld [vmem:[%s1294_s29 + $0x2c] sm:$0xf0] }
  0x31   : > { %v914_v27 = vor.u32 %v953_v22, %v911_v24  ;;  %v948_v28 = vld [vmem:[%s1294_s29 + $0x24] sm:$0xf]  ;;  %v887_v29 = vld [vmem:[%s1294_s29 + $0x30] sm:$0xf0]  ;;  %v893_v30 = vld [vmem:[%s1294_s29 + $0x28] sm:$0xf]  ;;  %v886_v31 = vor.u32 %v950_v26, %v885_v25 }
  0x32   : > { %414 = vmatpush.bf16.msra.mxu0 %v902_v18  ;;  %v951_v32 = vld [vmem:[%s1294_s29 + $0x34] sm:$0xf0]  ;;  %v949_v33 = vld [vmem:[%s1294_s29 + $0x2c] sm:$0xf]  ;;  %v895_v34 = vld [vmem:[%s1294_s29 + $0x38] sm:$0xf0]  ;;  %v890_v35 = vor.u32 %v948_v28, %v887_v29 }
  0x33   : > { %428 = vmatpush.bf16.msra.mxu1 %v906_v19  ;;  %442 = vmatpush.bf16.msra.mxu2 %v910_v23  ;;  %v894_v36 = vor.u32 %v951_v32, %v893_v30  ;;  %v869_v37 = vld [vmem:[%s1294_s29] sm:$0xf]  ;;  %v946_v38 = vld [vmem:[%s1294_s29 + $0xc] sm:$0xf0]  ;;  %v944_v39 = vld [vmem:[%s1294_s29 + $0x4] sm:$0xf]  ;;  %v898_v40 = vor.u32 %v949_v33, %v895_v34 }
  0x34   : > { %456 = vmatpush.bf16.msra.mxu3 %v914_v27  ;;  %v871_v41 = vld [vmem:[%s1294_s29 + $0x10] sm:$0xf0]  ;;  %v877_v42 = vld [vmem:[%s1294_s29 + $0x8] sm:$0xf]  ;;  %v947_v43 = vld [vmem:[%s1294_s29 + $0x14] sm:$0xf0]  ;;  %v870_v46 = vor.u32 %v946_v38, %v869_v37 }
  0x35   : > { %v945_v44 = vld [vmem:[%s1294_s29 + $0xc] sm:$0xf]  ;;  %v879_v45 = vld [vmem:[%s1294_s29 + $0x18] sm:$0xf0]  ;;  %v470_v47 = vld [vmem:[%s1465_s0] sm:$0xff]  ;;  %s935_s28 = sshll.u32 %s1187_s18, 9  ;;  %v874_v48 = vor.u32 %v944_v39, %v871_v41  ;;  %v878_v49 = vor.u32 %v947_v43, %v877_v42 }
  0x36   : > { %415 = vmatpush.bf16.msra.mxu0 %v886_v31  ;;  %v473_v50 = vstv %s935_s28  ;;  %v882_v51 = vor.u32 %v945_v44, %v879_v45  ;;  %v1202_v52 = vmov 0   ;;  %v943_v54 = vld [vmem:[%s1467_s2] sm:$0xff]  ;;  %vm405_vm1 = vcmask 523264   ;;  %v471_v55 = vld [vmem:[%s1465_s0 + $0x8] sm:$0xff]  ;;  %p936_p0 = scmp.ge.s32.totalorder %s1187_s18, 1 }
  0x37   : > { %429 = vmatpush.bf16.msra.mxu1 %v890_v35  ;;  %443 = vmatpush.bf16.msra.mxu2 %v894_v36  ;;  %v474_v53 = vsub.s32 %v470_v47, %v473_v50  ;;  %v475_v56 = vsub.s32 %v471_v55, %v473_v50  ;;  %v1345_v58 = vand.u32 127, %v465_v57  ;;  %v476_v22 = vld [vmem:[#allocation4] sm:$0xff]  ;;  %vm512_vm10 = vcmask 7168   ;;  %v477_v25 = vld [vmem:[#allocation4 + $0x8] sm:$0xff] }
  0x38   : > { %457 = vmatpush.bf16.msra.mxu3 %v898_v40  ;;  %1034 = vset.pattern.permute.xlu0 %v1202_v52 }
  0x39   : > { %479 = vperm.xlu0 %1034, %v474_v53   ;;  %v1348_v59 = vadd.s32 128, %v1345_v58  ;;  %v1359_v1 = vadd.s32 256, %v1345_v58  ;;  %v1362_v3 = vadd.s32 384, %v1345_v58 }
  0x3a   : > { %416 = vmatpush.bf16.msra.mxu0 %v870_v46 }
  0x3b   : > { %430 = vmatpush.bf16.msra.mxu1 %v874_v48  ;;  %444 = vmatpush.bf16.msra.mxu2 %v878_v49 }
  0x3c   : > { %458 = vmatpush.bf16.msra.mxu3 %v882_v51 }
  0x3d   : > { %931 = vmatmul.msk.bf16.vlgmr.msra.gmra.mxu0 %vm405_vm1, %v943_v54 }
  0x3e   : > { %932 = vmatmul.msk.bf16.vlgmr.msra.gmra.mxu1 %vm405_vm1, %v943_v54  ;;  %933 = vmatmul.msk.bf16.vlgmr.msra.gmra.mxu2 %vm405_vm1, %v943_v54 }
  0x3f   : > { %934 = vmatmul.msk.bf16.vlgmr.msra.gmra.mxu3 %vm405_vm1, %v943_v54 }
  0x41   : > { %482 = vperm.xlu0 %1034, %v475_v56  }
  0xab   : > { %v480_v60 = vpop.permute.xlu0 %479 }
  0xac   : > { %vm484_vm2 = vcmp.eq.s32.totalorder %v1345_v58, %v480_v60  ;;  %vm485_vm3 = vcmp.eq.s32.totalorder %v1348_v59, %v480_v60  ;;  %vm486_vm4 = vcmp.eq.s32.totalorder %v1359_v1, %v480_v60  ;;  %vm487_vm5 = vcmp.eq.s32.totalorder %v1362_v3, %v480_v60 }
  0xb3   : > { %v483_v5 = vpop.permute.xlu0 %482 }
  0xb4   : > { %vm488_vm6 = vcmp.eq.s32.totalorder %v1345_v58, %v483_v5  ;;  %vm489_vm7 = vcmp.eq.s32.totalorder %v1348_v59, %v483_v5  ;;  %vm490_vm8 = vcmp.eq.s32.totalorder %v1359_v1, %v483_v5  ;;  %vm491_vm9 = vcmp.eq.s32.totalorder %v1362_v3, %v483_v5 }
  0xba   : > { %v1352_v61 = vpop.f32.mrf.mxu0 }
  0xbb   : > { %v1354_v62 = vpop.f32.mrf.mxu1  ;;  %v492_v63 = vsel %vm484_vm2, %v1352_v61, 0.0 }
  0xbc   : > { %v493_v0 = vsel %vm485_vm3, %v1354_v62, 0.0 }
  0xbd   : > { %v500_v2 = vadd.f32 %v493_v0, %v492_v63 }
  0xc1   : > { %v1364_v4 = vpop.f32.mrf.mxu2 }
  0xc2   : > { %v494_v6 = vsel %vm486_vm4, %v1364_v4, 0.0  ;;  %v1368_v7 = vpop.f32.mrf.mxu3  ;;  %v1371_v9 = vpop.f32.mrf.mxu0 }
  0xc3   : > { %v501_v8 = vadd.f32 %v500_v2, %v494_v6  ;;  %v1373_v10 = vpop.f32.mrf.mxu1  ;;  %v495_v11 = vsel %vm487_vm5, %v1368_v7, 0.0  ;;  %v496_v13 = vsel %vm488_vm6, %v1371_v9, 0.0 }
  0xc4   : > { %v497_v14 = vsel %vm489_vm7, %v1373_v10, 0.0 }
  0xc5   : > { %v502_v12 = vadd.f32 %v501_v8, %v495_v11  ;;  %v505_v15 = vadd.f32 %v497_v14, %v496_v13 }
  0xc7   : > { %503 = vadd.xlane.f32.xlu1 %v502_v12 }
  0xc9   : > { %v1380_v16 = vpop.f32.mrf.mxu2 }
  0xca   : > { %v498_v17 = vsel %vm490_vm8, %v1380_v16, 0.0  ;;  %v1384_v18 = vpop.f32.mrf.mxu3 }
  0xcb   : > { %v506_v19 = vadd.f32 %v505_v15, %v498_v17  ;;  %v499_v20 = vsel %vm491_vm9, %v1384_v18, 0.0 }
  0xcd   : > { %v507_v21 = vadd.f32 %v506_v19, %v499_v20 }
  0xcf   : > { %508 = vadd.xlane.f32.xlu1 %v507_v21 }
 0x13a   : > { %v504_v23 = vpop.xlane.xlu1 %503 }
 0x13b   : > { %v510_v24 = vadd.f32 %v504_v23, %v476_v22 }
 0x13d   : > { %513 = vst.msk [vmem:[#allocation4] sm:$0xff] %vm512_vm10, %v510_v24 }
 0x141   : > { %518 = sbr.rel (%p936_p0) target bundleno = 708 (0x2c4), region = 48 }
 0x142   : > { %v509_v26 = vpop.xlane.xlu1 %508 }
 0x143   : > { %v511_v27 = vadd.f32 %v509_v26, %v477_v25 }
 0x145   : > { %514 = vst.msk [vmem:[#allocation4 + $0x8] sm:$0xff] %vm512_vm10, %v511_v27 }
 0x146   : > { %v519_v28 = vmax.f32 %v1352_v61, %v1364_v4  ;;  %v520_v29 = vmax.f32 %v1354_v62, %v1368_v7  ;;  %v524_v31 = vmax.f32 %v1371_v9, %v1380_v16  ;;  %v525_v32 = vmax.f32 %v1373_v10, %v1384_v18  ;;  %v529_v35 = vld [vmem:[#allocation2] sm:$0xff]  ;;  %v530_v39 = vld [vmem:[#allocation2 + $0x8] sm:$0xff]  ;;  %v539_v26 = vld [vmem:[#allocation3] sm:$0xff] }
 0x147   : > { %v1203_v34 = vmov 0  }
 0x148   : > { %v521_v30 = vmax.f32 %v519_v28, %v520_v29  ;;  %v526_v33 = vmax.f32 %v524_v31, %v525_v32  ;;  %1035 = vset.pattern.permute.xlu1 %v1203_v34  ;;  %1036 = vset.pattern.permute.xlu0 %v1203_v34  ;;  %v540_v31 = vld [vmem:[#allocation3 + $0x8] sm:$0xff] }
 0x14a   : > { %522 = vmax.xlane.f32.xlu0 %v521_v30 }
 0x152   : > { %527 = vmax.xlane.f32.xlu0 %v526_v33 }
 0x1bd   : > { %v523_v36 = vpop.xlane.xlu0 %522 }
 0x1be   : > { %v531_v37 = vmax.f32 %v529_v35, %v523_v36 }
 0x1c0   : > { %v533_v38 = vsub.f32 %v529_v35, %v531_v37  ;;  %591 = vst.msk [vmem:[#allocation2] sm:$0xff] %vm512_vm10, %v531_v37  ;;  %545 = vperm.xlu1 %1035, %v531_v37  }
 0x1c2   : > { %v535_v23 = vmul.f32 1.442695, %v533_v38 }
 0x1c5   : > { %v528_v40 = vpop.xlane.xlu0 %527 }
 0x1c6   : > { %v532_v41 = vmax.f32 %v530_v39, %v528_v40 }
 0x1c8   : > { %v534_v42 = vsub.f32 %v530_v39, %v532_v41  ;;  %592 = vst.msk [vmem:[#allocation2 + $0x8] sm:$0xff] %vm512_vm10, %v532_v41  ;;  %550 = vperm.xlu1 %1035, %v532_v41  }
 0x1ca   : > { %v537_v24 = vmul.f32 1.442695, %v534_v42 }
 0x232   : > { %v546_v43 = vpop.permute.xlu1 %545 }
 0x233   : > { %v553_v44 = vsub.f32 %v1352_v61, %v546_v43  ;;  %v554_v45 = vsub.f32 %v1354_v62, %v546_v43  ;;  %v555_v46 = vsub.f32 %v1364_v4, %v546_v43  ;;  %v556_v47 = vsub.f32 %v1368_v7, %v546_v43 }
 0x235   : > { %v561_v48 = vmul.f32 1.442695, %v553_v44  ;;  %v563_v49 = vmul.f32 1.442695, %v554_v45  ;;  %v565_v50 = vmul.f32 1.442695, %v555_v46 }
 0x236   : > { %v567_v51 = vmul.f32 1.442695, %v556_v47 }
 0x237   : > { %1037 = vpow2.f32 %v561_v48 }
 0x238   : > { %1039 = vpow2.f32 %v563_v49 }
 0x239   : > { %1041 = vpow2.f32 %v565_v50 }
 0x23a   : > { %v551_v52 = vpop.permute.xlu1 %550  ;;  %1043 = vpow2.f32 %v567_v51 }
 0x23b   : > { %v557_v53 = vsub.f32 %v1371_v9, %v551_v52  ;;  %v558_v54 = vsub.f32 %v1373_v10, %v551_v52  ;;  %v559_v55 = vsub.f32 %v1380_v16, %v551_v52  ;;  %v560_v56 = vsub.f32 %v1384_v18, %v551_v52 }
 0x23d   : > { %v1038_v57 = vpop.eup %1037  ;;  %v569_v60 = vmul.f32 1.442695, %v557_v53  ;;  %v571_v63 = vmul.f32 1.442695, %v558_v54  ;;  %v573_v2 = vmul.f32 1.442695, %v559_v55 }
 0x23e   : > { %v1040_v0 = vpop.eup %1039  ;;  %v575_v8 = vmul.f32 1.442695, %v560_v56 }
 0x23f   : > { %1045 = vpow2.f32 %v569_v60  ;;  %v577_v5 = vadd.f32 %v1040_v0, %v1038_v57  ;;  %v1042_v6 = vpop.eup %1041 }
 0x240   : > { %1047 = vpow2.f32 %v571_v63  ;;  %v1044_v12 = vpop.eup %1043 }
 0x241   : > { %v578_v11 = vadd.f32 %v1042_v6, %v577_v5  ;;  %1049 = vpow2.f32 %v573_v2 }
 0x242   : > { %1051 = vpow2.f32 %v575_v8 }
 0x243   : > { %v579_v13 = vadd.f32 %v1044_v12, %v578_v11  ;;  %1053 = vpow2.f32 %v535_v23 }
 0x244   : > { %1055 = vpow2.f32 %v537_v24 }
 0x245   : > { %v1046_v14 = vpop.eup %1045  ;;  %580 = vadd.xlane.f32.xlu2 %v579_v13 }
 0x246   : > { %v1048_v15 = vpop.eup %1047 }
 0x247   : > { %v582_v17 = vadd.f32 %v1048_v15, %v1046_v14  ;;  %v1050_v19 = vpop.eup %1049 }
 0x248   : > { %v1052_v21 = vpop.eup %1051 }
 0x249   : > { %v583_v20 = vadd.f32 %v1050_v19, %v582_v17  ;;  %v1054_v25 = vpop.eup %1053 }
 0x24a   : > { %v541_v27 = vmul.f32 %v1054_v25, %v539_v26  ;;  %v1056_v30 = vpop.eup %1055 }
 0x24b   : > { %v584_v22 = vadd.f32 %v1052_v21, %v583_v20  ;;  %v542_v32 = vmul.f32 %v1056_v30, %v540_v31 }
 0x24d   : > { %585 = vadd.xlane.f32.xlu2 %v584_v22 }
 0x2b8   : > { %v581_v28 = vpop.xlane.xlu2 %580 }
 0x2b9   : > { %v587_v29 = vadd.f32 %v581_v28, %v541_v27 }
 0x2bb   : > { %589 = vst.msk [vmem:[#allocation3] sm:$0xff] %vm512_vm10, %v587_v29 }
 0x2c0   : > { %v586_v33 = vpop.xlane.xlu2 %585 }
 0x2c1   : > { %v588_v34 = vadd.f32 %v586_v33, %v542_v32 }
 0x2c3   : > { %590 = vst.msk [vmem:[#allocation3 + $0x8] sm:$0xff] %vm512_vm10, %v588_v34 }
 0x2c4 PF: > { %p937_p1 = scmp.ne.s32.totalorder %s1187_s18, 1 }
 0x2c5   : > { %s597_s8 = ssub.s32 (!%p937_p1), 1000, %s935_s28 }
 0x2c6   : > { %596 = sbr.rel (%p937_p1) target bundleno = 1311 (0x51f), region = 52 }
 0x2cb   : > { %v598_v35 = vstv %s597_s8  ;;  %v699_v28 = vld [vmem:[%s1466_s1] sm:$0xff]  ;;  %v700_v29 = vld [vmem:[%s1466_s1 + $0x8] sm:$0xff]  ;;  %vm730_vm15 = vcmp.eq.s32.totalorder %v1345_v58, 1  ;;  %vm729_vm0 = vcmp.eq.s32.totalorder %v1345_v58, 0 }
 0x2cc   : > { %vm599_vm11 = vcmp.lt.s32.totalorder %v1345_v58, %v598_v35  ;;  %vm600_vm12 = vcmp.lt.s32.totalorder %v1348_v59, %v598_v35  ;;  %vm601_vm13 = vcmp.lt.s32.totalorder %v1359_v1, %v598_v35  ;;  %vm602_vm14 = vcmp.lt.s32.totalorder %v1362_v3, %v598_v35 }
 0x2cd   : > { %v603_v36 = vsel %vm599_vm11, %v1352_v61, -1e+30  ;;  %v604_v37 = vsel %vm600_vm12, %v1354_v62, -1e+30  ;;  %v605_v38 = vsel %vm601_vm13, %v1364_v4, -1e+30 }
 0x2ce   : > { %v606_v39 = vsel %vm602_vm14, %v1368_v7, -1e+30  ;;  %v611_v40 = vmax.f32 %v603_v36, %v605_v38  ;;  %v607_v42 = vsel %vm599_vm11, %v1371_v9, -1e+30  ;;  %v608_v43 = vsel %vm600_vm12, %v1373_v10, -1e+30 }
 0x2cf   : > { %v612_v41 = vmax.f32 %v604_v37, %v606_v39  ;;  %v609_v59 = vsel %vm601_vm13, %v1380_v16, -1e+30  ;;  %v610_v1 = vsel %vm602_vm14, %v1384_v18, -1e+30  ;;  %v1204_v62 = vmov 0   ;;  %v621_v4 = vld [vmem:[#allocation2] sm:$0xff] }
 0x2d0   : > { %v616_v3 = vmax.f32 %v607_v42, %v609_v59  ;;  %v617_v61 = vmax.f32 %v608_v43, %v610_v1  ;;  %1057 = vset.pattern.permute.xlu1 %v1204_v62  ;;  %1058 = vset.pattern.permute.xlu0 %v1204_v62  ;;  %v622_v9 = vld [vmem:[#allocation2 + $0x8] sm:$0xff]  ;;  %v717_v30 = vsel %vm512_vm10, %v699_v28, 0.0  ;;  %v718_v31 = vsel %vm512_vm10, %v700_v29, 0.0 }
 0x2d1   : > { %v613_v44 = vmax.f32 %v611_v40, %v612_v41  ;;  %v719_v32 = vadd.f32 %v718_v31, %v717_v30  ;;  %v632_v41 = vld [vmem:[#allocation3 + $0x8] sm:$0xff] }
 0x2d2   : > { %v618_v45 = vmax.f32 %v616_v3, %v617_v61 }
 0x2d3   : > { %614 = vmax.xlane.f32.xlu0 %v613_v44 }
 0x2db   : > { %619 = vmax.xlane.f32.xlu0 %v618_v45 }
 0x346   : > { %v615_v7 = vpop.xlane.xlu0 %614 }
 0x347   : > { %v623_v46 = vmax.f32 %v621_v4, %v615_v7 }
 0x349   : > { %v625_v47 = vsub.f32 %v621_v4, %v623_v46  ;;  %683 = vst.msk [vmem:[#allocation2] sm:$0xff] %vm512_vm10, %v623_v46  ;;  %637 = vperm.xlu1 %1057, %v623_v46   ;;  %v695_v4 = vld [vmem:[#allocation4] sm:$0xff] }
 0x34b   : > { %v627_v33 = vmul.f32 1.442695, %v625_v47 }
 0x34e   : > { %v620_v10 = vpop.xlane.xlu0 %619 }
 0x34f   : > { %v624_v16 = vmax.f32 %v622_v9, %v620_v10  ;;  %v696_v10 = vld [vmem:[#allocation4 + $0x8] sm:$0xff] }
 0x350   : > { %v685_v45 = vld [vmem:[#allocation2] sm:$0xff] }
 0x351   : > { %v626_v18 = vsub.f32 %v622_v9, %v624_v16  ;;  %684 = vst.msk [vmem:[#allocation2 + $0x8] sm:$0xff] %vm512_vm10, %v624_v16  ;;  %642 = vperm.xlu1 %1057, %v624_v16  }
 0x353   : > { %v629_v34 = vmul.f32 1.442695, %v626_v18 }
 0x358   : > { %v686_v9 = vld [vmem:[#allocation2 + $0x8] sm:$0xff] }
 0x37b   : > { %720 = vadd.xlane.f32.xlu1 %v719_v32 }
 0x3bb   : > { %v638_v48 = vpop.permute.xlu1 %637 }
 0x3bc   : > { %v645_v49 = vsub.f32 %v603_v36, %v638_v48  ;;  %v646_v50 = vsub.f32 %v604_v37, %v638_v48  ;;  %v647_v51 = vsub.f32 %v605_v38, %v638_v48  ;;  %v648_v52 = vsub.f32 %v606_v39, %v638_v48  ;;  %v631_v36 = vld [vmem:[#allocation3] sm:$0xff] }
 0x3be   : > { %v653_v53 = vmul.f32 1.442695, %v645_v49  ;;  %v655_v54 = vmul.f32 1.442695, %v646_v50  ;;  %v657_v55 = vmul.f32 1.442695, %v647_v51 }
 0x3bf   : > { %v659_v56 = vmul.f32 1.442695, %v648_v52 }
 0x3c0   : > { %1059 = vpow2.f32 %v653_v53 }
 0x3c1   : > { %1061 = vpow2.f32 %v655_v54 }
 0x3c2   : > { %1063 = vpow2.f32 %v657_v55 }
 0x3c3   : > { %v643_v57 = vpop.permute.xlu1 %642  ;;  %1065 = vpow2.f32 %v659_v56 }
 0x3c4   : > { %v649_v60 = vsub.f32 %v607_v42, %v643_v57  ;;  %v650_v63 = vsub.f32 %v608_v43, %v643_v57  ;;  %v651_v0 = vsub.f32 %v609_v59, %v643_v57  ;;  %v652_v2 = vsub.f32 %v610_v1, %v643_v57 }
 0x3c6   : > { %v1060_v5 = vpop.eup %1059  ;;  %v661_v6 = vmul.f32 1.442695, %v649_v60  ;;  %v663_v8 = vmul.f32 1.442695, %v650_v63  ;;  %v665_v12 = vmul.f32 1.442695, %v651_v0 }
 0x3c7   : > { %v1062_v11 = vpop.eup %1061  ;;  %v667_v15 = vmul.f32 1.442695, %v652_v2 }
 0x3c8   : > { %1067 = vpow2.f32 %v661_v6  ;;  %v669_v13 = vadd.f32 %v1062_v11, %v1060_v5  ;;  %v1064_v14 = vpop.eup %1063 }
 0x3c9   : > { %1069 = vpow2.f32 %v663_v8  ;;  %v1066_v19 = vpop.eup %1065 }
 0x3ca   : > { %v670_v17 = vadd.f32 %v1064_v14, %v669_v13  ;;  %1071 = vpow2.f32 %v665_v12 }
 0x3cb   : > { %1073 = vpow2.f32 %v667_v15 }
 0x3cc   : > { %v671_v20 = vadd.f32 %v1066_v19, %v670_v17  ;;  %1075 = vpow2.f32 %v627_v33 }
 0x3cd   : > { %1077 = vpow2.f32 %v629_v34 }
 0x3ce   : > { %v1068_v21 = vpop.eup %1067  ;;  %672 = vadd.xlane.f32.xlu2 %v671_v20 }
 0x3cf   : > { %v1070_v22 = vpop.eup %1069 }
 0x3d0   : > { %v674_v23 = vadd.f32 %v1070_v22, %v1068_v21  ;;  %v1072_v24 = vpop.eup %1071 }
 0x3d1   : > { %v1074_v26 = vpop.eup %1073 }
 0x3d2   : > { %v675_v25 = vadd.f32 %v1072_v24, %v674_v23  ;;  %v1076_v35 = vpop.eup %1075 }
 0x3d3   : > { %v633_v37 = vmul.f32 %v1076_v35, %v631_v36  ;;  %v1078_v40 = vpop.eup %1077 }
 0x3d4   : > { %v676_v27 = vadd.f32 %v1074_v26, %v675_v25  ;;  %v634_v42 = vmul.f32 %v1078_v40, %v632_v41 }
 0x3d6   : > { %677 = vadd.xlane.f32.xlu2 %v676_v27 }
 0x3ee   : > { %v721_v55 = vpop.xlane.xlu1 %720 }
 0x3ef   : > { %v722_v56 = vrot.slane %v721_v55, 4 }
 0x3f1   : > { %v723_v57 = vadd.f32 %v722_v56, %v721_v55 }
 0x3f3   : > { %v724_v60 = vrot.slane %v723_v57, 2 }
 0x3f5   : > { %v725_v5 = vadd.f32 %v724_v60, %v723_v57 }
 0x3f7   : > { %v726_v11 = vrot.slane %v725_v5, 1 }
 0x3f9   : > { %v727_v14 = vadd.f32 %v726_v11, %v725_v5 }
 0x441   : > { %v673_v38 = vpop.xlane.xlu2 %672 }
 0x442   : > { %v679_v39 = vadd.f32 %v673_v38, %v633_v37 }
 0x444   : > { %681 = vst.msk [vmem:[#allocation3] sm:$0xff] %vm512_vm10, %v679_v39 }
 0x449   : > { %v678_v43 = vpop.xlane.xlu2 %677 }
 0x44a   : > { %v680_v59 = vadd.f32 %v678_v43, %v634_v42 }
 0x44b   : > { %v687_v1 = vld [vmem:[#allocation3] sm:$0xff] }
 0x44c   : > { %682 = vst.msk [vmem:[#allocation3 + $0x8] sm:$0xff] %vm512_vm10, %v680_v59  ;;  %1079 = vlog2.f32 %v687_v1 }
 0x452   : > { %v1080_v44 = vpop.eup %1079 }
 0x453   : > { %v688_v3 = vld [vmem:[#allocation3 + $0x8] sm:$0xff]  ;;  %v690_v61 = vmul.f32 0.6931472, %v1080_v44 }
 0x454   : > { %1081 = vlog2.f32 %v688_v3 }
 0x455   : > { %v693_v62 = vadd.f32 %v690_v61, %v685_v45 }
 0x457   : > { %v697_v7 = vsub.f32 %v695_v4, %v693_v62 }
 0x459   : > { %v701_v18 = vsub.f32 0.0, %v697_v7 }
 0x45a   : > { %v1082_v46 = vpop.eup %1081 }
 0x45b   : > { %v692_v47 = vmul.f32 0.6931472, %v1082_v46  ;;  %v703_v50 = vmul.f32 %v701_v18, %v699_v28 }
 0x45d   : > { %v694_v16 = vadd.f32 %v692_v47, %v686_v9  ;;  %v705_v52 = vsel %vm512_vm10, %v703_v50, 0.0 }
 0x45f   : > { %v698_v48 = vsub.f32 %v696_v10, %v694_v16 }
 0x461   : > { %v702_v49 = vsub.f32 0.0, %v698_v48 }
 0x463   : > { %v704_v51 = vmul.f32 %v702_v49, %v700_v29 }
 0x465   : > { %v706_v53 = vsel %vm512_vm10, %v704_v51, 0.0 }
 0x466   : > { %v707_v54 = vadd.f32 %v706_v53, %v705_v52 }
 0x468   : > { %708 = vadd.xlane.f32.xlu0 %v707_v54 }
 0x4db   : > { %v709_v63 = vpop.xlane.xlu0 %708 }
 0x4dc   : > { %v710_v0 = vrot.slane %v709_v63, 4 }
 0x4de   : > { %v711_v2 = vadd.f32 %v710_v0, %v709_v63 }
 0x4e0   : > { %v712_v6 = vrot.slane %v711_v2, 2 }
 0x4e2   : > { %v713_v8 = vadd.f32 %v712_v6, %v711_v2 }
 0x4e4   : > { %v714_v12 = vrot.slane %v713_v8, 1 }
 0x4e6   : > { %v715_v13 = vadd.f32 %v714_v12, %v713_v8 }
 0x4e8   : > { %960 = vpush %v715_v13 }
 0x4e9   : > { %962 = vpush %v727_v14 }
 0x519   : > { %s961_s12 = spop %960 }
 0x51a   : > { %v733_v15 = vstv %s961_s12  ;;  %s963_s13 = spop %962 }
 0x51b   : > { %v731_v17 = vstv %s963_s13 }
 0x51c   : > { %v732_v19 = vsel %vm730_vm15, %v731_v17, 0.0 }
 0x51d   : > { %v734_v20 = vsel %vm729_vm0, %v733_v15, %v732_v19 }
 0x51e   : > { %735 = vst [vmem:[#allocation8] sm:$0x1] %v734_v20 }
 0x51f PF: > { %p975_p2 = scmp.eq.s32.totalorder %s851_s21, 1  ;;  %s745_s23 = sshll.u32 %s1469_s4, 4  ;;  %s746_s23 = int_to_ptr.hbm [resolvable:$true] %s745_s23 }
 0x520   : > { %s1205_s25 = smov [#allocation8]  }
 0x521   : > { %s743_s29 = sshll.u32 %s1205_s25, 4  ;;  %s744_s29 = int_to_ptr.vmem [resolvable:$true] %s743_s29 }
 0x522   : > { %967 = dma.vmem_to_hbm [thread:$0]  (%p975_p2), %s744_s29, 16, %s746_s23, [#allocation7]  }
 0x523   : > { %1170 = dma.done.wait (%p975_p2), [#allocation7], 16  }
 0x524   : > { %1172 = vsyncadd (%p975_p2), [#allocation7], 4294967280 }
 0x525 PF: > { %s18_s20 = sadd.s32 1, %s1195_s20   ;;  %s1472_s15 = smov %s1179_s16 }
 0x526   : > { %p15_p3 = scmp.ge.s32.totalorder %s18_s20, 4   ;;  %s1473_s16 = smov %s1183_s17 }
 0x527   : > { %s1474_s17 = smov %s1282_s27  ;;  %s1475_s18 = smov %s1191_s19 }
 0x528   : > { %s1476_s19 = smov %s1478_s22  ;;  %17 = sbr.rel (!%p15_p3) target bundleno = 5 (0x5), region = 95 }
 0x52d   :  { %759 = vsyncpa [#allocation6], 1 }
 0x52e   :  { %761 = vsyncpa [#allocation6 + $0x1], 1 }
 0x52f   :  { %762 = vsyncpa [#allocation7], 1 }
 0x530   :  { %764 = vsyncpa [#allocation7 + $0x1], 1 }

</bundles_post_ra>
